<compile_context>
chip_gen: v7x
topology: tpu7x:2x2x1
jax: 0.10.0
libtpu: 0.0.40
codegen_flags: <defaults>
</compile_context>

<pallas_src>
import functools

import jax
import jax.numpy as jnp
from jax import lax
from jax.experimental import pallas as pl
from jax.experimental.pallas import tpu as pltpu

EPS = 1e-5

# VMEM accounting per element of an input tile: 2x input + 2x output double
# buffers (input dtype) plus ~4 f32-tile-sized temporaries in the body.
_BUDGET_BYTES = 28 * 1024 * 1024       # target working-set, all generations
_VMEM_LIMIT_BYTES = 48 * 1024 * 1024   # <= v7x 64 MiB physical, > v5e 16 MiB default


def _adain_kernel(x_ref, ab_ref, o_ref, *, hw):
    """Fast path: each grid step handles `tr` complete (b, c) rows."""
    x = x_ref[...].astype(jnp.float32)                     # (tr, HW)

    # Shifted single-pass statistics (stable when |mean| >> std).
    c = x[:, 0:1]
    xc = x - c
    inv_n = jnp.float32(1.0 / hw)
    mean_c = jnp.sum(xc, axis=1, keepdims=True) * inv_n
    var = jnp.maximum(
        jnp.sum(xc * xc, axis=1, keepdims=True) * inv_n - mean_c * mean_c, 0.0)
    mean = mean_c + c

    a = ab_ref[:, 0:1]                                     # 1 + gamma
    b = ab_ref[:, 1:2]                                     # beta
    scale = a * lax.rsqrt(var + EPS)
    shift = b - mean * scale
    # Re-read x so the f32 working copy need not stay live across both passes.
    o_ref[...] = (x_ref[...].astype(jnp.float32) * scale + shift).astype(o_ref.dtype)


def _adain_big_kernel(x_ref, ab_ref, o_ref, ssum_ref, ssq_ref, c_ref, *, hw, thw):
    """Large-H*W path: grid = (row_tiles, 2, spatial_tiles).

    Phase 0 (p == 0) accumulates per-row sum / sum-of-squares over spatial
    tiles into scratch; phase 1 re-streams x and writes the normalized +
    affined output.  Padded lanes of a ragged last spatial tile are masked
    out of the sums; OOB output writes are dropped by Pallas.
    """
    p = pl.program_id(1)
    sp = pl.program_id(2)

    @pl.when(p == 0)
    def _():
        x = x_ref[...].astype(jnp.float32)                 # (tr, thw)

        @pl.when(sp == 0)
        def _():
            ssum_ref[...] = jnp.zeros_like(ssum_ref)
            ssq_ref[...] = jnp.zeros_like(ssq_ref)
            c_ref[...] = x[:, 0:1]                          # per-row shift

        lane = lax.broadcasted_iota(jnp.int32, x.shape, 1) + sp * thw
        xc = jnp.where(lane < hw, x - c_ref[...], 0.0)
        ssum_ref[...] += jnp.sum(xc, axis=1, keepdims=True)
        ssq_ref[...] += jnp.sum(xc * xc, axis=1, keepdims=True)

    @pl.when(p == 1)
    def _():
        inv_n = jnp.float32(1.0 / hw)
        mean_c = ssum_ref[...] * inv_n
        var = jnp.maximum(ssq_ref[...] * inv_n - mean_c * mean_c, 0.0)
        mean = mean_c + c_ref[...]
        a = ab_ref[:, 0:1]
        b = ab_ref[:, 1:2]
        scale = a * lax.rsqrt(var + EPS)
        shift = b - mean * scale
        o_ref[...] = (x_ref[...].astype(jnp.float32) * scale + shift).astype(o_ref.dtype)


def adain(x, s, fc_weight, fc_bias):
    """x: (B, C, H, W) NCHW, s: (B, S), fc_weight: (2C, S), fc_bias: (2C,)."""
    B, C, H, W = x.shape
    HW = H * W
    N = B * C
    out_dtype = x.dtype

    # ---- style FC hoisted off the grid: one (B,S) x (S,2C) matmul in XLA ----
    h = (s.astype(jnp.float32) @ fc_weight.astype(jnp.float32).T
         + fc_bias.astype(jnp.float32))                    # (B, 2C)
    gamma = h[:, :C]
    beta = h[:, C:]
    # One (N, 2) side input: col 0 = (1 + gamma), col 1 = beta, row = (b, c).
    ab = jnp.stack([(1.0 + gamma).reshape(N), beta.reshape(N)], axis=1)  # f32

    # (B, C) -> sublanes, (H, W) -> lanes.  Contiguous reshape: no HBM copy.
    x2 = x.reshape(N, HW)

    itemsize = x.dtype.itemsize
    row_lanes = pl.cdiv(HW, 128) * 128                     # physical lanes / row
    per_elem = 4 * itemsize + 16                           # see _BUDGET_BYTES note

    if 8 * row_lanes * per_elem <= _BUDGET_BYTES:
        # ------------------- fast path: whole rows per block -------------------
        tr = _BUDGET_BYTES // (row_lanes * per_elem)
        tr = max(8, (tr // 8) * 8)
        if N >= 8:
            tr = min(tr, (N // 8) * 8)
        else:
            tr = N                                         # block dim == full dim
        if N >= 16 and pl.cdiv(N, tr) == 1:
            # Keep >=2 grid steps so the "parallel" axis can use both v7x cores.
            tr = ((pl.cdiv(N, 2) + 7) // 8) * 8

        out = pl.pallas_call(
            functools.partial(_adain_kernel, hw=HW),
            out_shape=jax.ShapeDtypeStruct((N, HW), out_dtype),
            grid=(pl.cdiv(N, tr),),
            in_specs=[
                pl.BlockSpec((tr, HW), lambda r: (r, 0)),   # x rows, lane-dense
                pl.BlockSpec((tr, 2), lambda r: (r, 0)),    # (1+gamma, beta)
            ],
            out_specs=pl.BlockSpec((tr, HW), lambda r: (r, 0)),
            compiler_params=pltpu.CompilerParams(
                dimension_semantics=("parallel",),
                vmem_limit_bytes=_VMEM_LIMIT_BYTES),
        )(x2, ab)
    else:
        # ---------- large-image path: spatial tiling + two-sweep stats ----------
        tr = 8 if N >= 8 else N
        thw = max(128, (_BUDGET_BYTES // (tr * per_elem) // 128) * 128)
        thw = min(thw, row_lanes)
        st = pl.cdiv(HW, thw)

        out = pl.pallas_call(
            functools.partial(_adain_big_kernel, hw=HW, thw=thw),
            out_shape=jax.ShapeDtypeStruct((N, HW), out_dtype),
            grid=(pl.cdiv(N, tr), 2, st),
            in_specs=[
                pl.BlockSpec((tr, thw), lambda r, ph, sp: (r, sp)),
                pl.BlockSpec((tr, 2), lambda r, ph, sp: (r, 0)),
            ],
            # During the stats sweep (ph == 0) the output window stays parked
            # on block (r, 0) so nothing is written back until phase 1.
            out_specs=pl.BlockSpec((tr, thw), lambda r, ph, sp: (r, sp * ph)),
            scratch_shapes=[
                pltpu.VMEM((tr, 1), jnp.float32),           # sum(x - c)
                pltpu.VMEM((tr, 1), jnp.float32),           # sum((x - c)^2)
                pltpu.VMEM((tr, 1), jnp.float32),           # per-row shift c
            ],
            compiler_params=pltpu.CompilerParams(
                dimension_semantics=("parallel", "arbitrary", "arbitrary"),
                vmem_limit_bytes=_VMEM_LIMIT_BYTES),
        )(x2, ab)

    return out.reshape(B, C, H, W)


def adain_reference(x, s, fc_weight, fc_bias):
    """Pure-JAX reference mirroring the PyTorch forward."""
    B, C, H, W = x.shape
    h = s @ fc_weight.T + fc_bias                          # (B, 2C)
    gamma = h[:, :C].reshape(B, C, 1, 1)
    beta = h[:, C:].reshape(B, C, 1, 1)
    mean = jnp.mean(x, axis=(2, 3), keepdims=True)
    var = jnp.var(x, axis=(2, 3), keepdims=True)           # biased, like InstanceNorm2d
    xn = (x - mean) / jnp.sqrt(var + EPS)
    return (1.0 + gamma) * xn + beta


if __name__ == "__main__":
    # Small shapes consistent with the module: num_features=4, style_dim=8.
    B, C, H, W = 2, 4, 16, 16
    S = 8

    key = jax.random.PRNGKey(0)
    kx, ks, kw, kb = jax.random.split(key, 4)

    x = jax.random.normal(kx, (B, C, H, W), dtype=jnp.float32)
    s = jax.random.normal(ks, (B, S), dtype=jnp.float32)

    # Deterministic synthetic fc parameters (shape follows nn.Linear(S, 2C)).
    bound = 1.0 / (S ** 0.5)
    fc_weight = jax.random.uniform(kw, (2 * C, S), jnp.float32, -bound, bound)
    fc_bias = jax.random.uniform(kb, (2 * C,), jnp.float32, -bound, bound)

    out = adain(x, s, fc_weight, fc_bias)
    out = jax.block_until_ready(out)

    ref = adain_reference(x, s, fc_weight, fc_bias)
    assert out.shape == (B, C, H, W)
    err = float(jnp.max(jnp.abs(out - ref)))
    assert err < 1e-4, err

    print("KERNEL_OK")
</pallas_src>

<mosaic_0001>
module attributes {stable_mosaic.version = 11 : i64} {
  func.func @_adain_kernel(%arg0: i32, %arg1: memref<8x256xf32, #tpu.memory_space<vmem>>, %arg2: memref<8x2xf32, #tpu.memory_space<vmem>>, %arg3: memref<8x256xf32, #tpu.memory_space<vmem>>) attributes {dimension_semantics = [#tpu.dimension_semantics<parallel>], iteration_bounds = array<i64: 1>, scalar_prefetch = 0 : i64, scratch_operands = 0 : i64, tpu.core_type = #tpu.core_type<tc>, window_params = [{transform_indices = @transform_0, window_bounds = array<i64: 8, 256>}, {transform_indices = @transform_1, window_bounds = array<i64: 8, 2>}, {transform_indices = @transform_2, window_bounds = array<i64: 8, 256>}]} {
    %c0 = arith.constant 0 : index
    %c0_0 = arith.constant 0 : index
    %0 = vector.load %arg1[%c0, %c0_0] : memref<8x256xf32, #tpu.memory_space<vmem>>, vector<8x256xf32>
    %1 = vector.extract_strided_slice %0 {offsets = [0, 0], sizes = [8, 1], strides = [1, 1]} : vector<8x256xf32> to vector<8x1xf32>
    %2 = vector.broadcast %1 : vector<8x1xf32> to vector<8x256xf32>
    %3 = arith.subf %0, %2 : vector<8x256xf32>
    %cst = arith.constant dense<0.000000e+00> : vector<8xf32>
    %4 = vector.multi_reduction <add>, %3, %cst [1] : vector<8x256xf32> to vector<8xf32>
    %5 = vector.shape_cast %4 : vector<8xf32> to vector<8x1xf32>
    %cst_1 = arith.constant 3.906250e-03 : f32
    %6 = vector.broadcast %cst_1 : f32 to vector<8x1xf32>
    %7 = arith.mulf %5, %6 : vector<8x1xf32>
    %8 = arith.mulf %3, %3 : vector<8x256xf32>
    %cst_2 = arith.constant dense<0.000000e+00> : vector<8xf32>
    %9 = vector.multi_reduction <add>, %8, %cst_2 [1] : vector<8x256xf32> to vector<8xf32>
    %10 = vector.shape_cast %9 : vector<8xf32> to vector<8x1xf32>
    %cst_3 = arith.constant 3.906250e-03 : f32
    %11 = vector.broadcast %cst_3 : f32 to vector<8x1xf32>
    %12 = arith.mulf %10, %11 : vector<8x1xf32>
    %13 = arith.mulf %7, %7 : vector<8x1xf32>
    %14 = arith.subf %12, %13 : vector<8x1xf32>
    %cst_4 = arith.constant 0.000000e+00 : f32
    %15 = vector.broadcast %cst_4 : f32 to vector<8x1xf32>
    %16 = arith.maximumf %14, %15 : vector<8x1xf32>
    %17 = arith.addf %7, %1 : vector<8x1xf32>
    %c0_5 = arith.constant 0 : index
    %c0_6 = arith.constant 0 : index
    %18 = vector.load %arg2[%c0_5, %c0_6] : memref<8x2xf32, #tpu.memory_space<vmem>>, vector<8x1xf32>
    %c0_7 = arith.constant 0 : index
    %c1 = arith.constant 1 : index
    %19 = vector.load %arg2[%c0_7, %c1] : memref<8x2xf32, #tpu.memory_space<vmem>>, vector<8x1xf32>
    %cst_8 = arith.constant 9.99999974E-6 : f32
    %20 = vector.broadcast %cst_8 : f32 to vector<8x1xf32>
    %21 = arith.addf %16, %20 : vector<8x1xf32>
    %22 = math.rsqrt %21 : vector<8x1xf32>
    %23 = arith.mulf %18, %22 : vector<8x1xf32>
    %24 = arith.mulf %17, %23 : vector<8x1xf32>
    %25 = arith.subf %19, %24 : vector<8x1xf32>
    %c0_9 = arith.constant 0 : index
    %c0_10 = arith.constant 0 : index
    %26 = vector.load %arg1[%c0_9, %c0_10] : memref<8x256xf32, #tpu.memory_space<vmem>>, vector<8x256xf32>
    %27 = vector.broadcast %23 : vector<8x1xf32> to vector<8x256xf32>
    %28 = arith.mulf %26, %27 : vector<8x256xf32>
    %29 = vector.broadcast %25 : vector<8x1xf32> to vector<8x256xf32>
    %30 = arith.addf %28, %29 : vector<8x256xf32>
    %c0_11 = arith.constant 0 : index
    %c0_12 = arith.constant 0 : index
    %31 = vector.load %arg3[%c0_11, %c0_12] : memref<8x256xf32, #tpu.memory_space<vmem>>, vector<8x256xf32>
    tpu.vector_store %arg3[%c0_11, %c0_12], %30 {strides = array<i32>} : memref<8x256xf32, #tpu.memory_space<vmem>>, vector<8x256xf32>,
    return
  }
  func.func @transform_0(%arg0: i32) -> (i32, i32) {
    %c0_i32 = arith.constant 0 : i32
    %c0_i32_0 = arith.constant 0 : i32
    return %arg0, %c0_i32 : i32, i32
  }
  func.func @transform_1(%arg0: i32) -> (i32, i32) {
    %c0_i32 = arith.constant 0 : i32
    %c0_i32_0 = arith.constant 0 : i32
    return %arg0, %c0_i32 : i32, i32
  }
  func.func @transform_2(%arg0: i32) -> (i32, i32) {
    %c0_i32 = arith.constant 0 : i32
    %c0_i32_0 = arith.constant 0 : i32
    return %arg0, %c0_i32 : i32, i32
  }
}

</mosaic_0001>

<bundles_post_ra>
// kernel: tpu_custom_call.1
= control target key start
LH: loop header
LB: loop body
LE: loop exit
PB: predicated region body
PF: predicated region fallthrough
CT: control target
= control target key end

     0   :  { %7 = vsyncpa [#allocation3], 0  ;;  %s194_s0 = inlined_call_operand.hbm [shape: f32[8,256], index: 0, kind: input, shape index: {}]   ;;  %s195_s1 = inlined_call_operand.vmem [shape: f32[8,2], index: 1, kind: input, shape index: {}]   ;;  %s196_s2 = inlined_call_operand.hbm [shape: f32[8,256], index: 2, kind: output, shape index: {}]  }
   0x1   :  { %8 = vsyncpa [#allocation4], 0  ;;  %s147_s9 = smov [#allocation2]   ;;  %s99_s13 = scalar_lea.hbm %s194_s0, 256 }
   0x2   :  { %s15_s10 = sshll.u32 %s147_s9, 4  ;;  %p100_p0 = scmp.ne.s32.totalorder %s194_s0, %s99_s13  ;;  %s16_s10 = int_to_ptr.vmem [resolvable:$true] %s15_s10 }
   0x3   :  { %p103_p1 = scmp.lt.u32.totalorder %s99_s13, %s194_s0 }
   0x5   :  { %p105_p2 = pnand %p103_p1, %p100_p0 }
   0x7   :  { %108 = shalt.err (!%p105_p2)
}
   0x8   :  { %s109_s18 = scalar_lea.vmem %s16_s10, 256  ;;  %p114_p4 = scmp.lt.s32.totalorder %s16_s10, %s16_s10 }
   0x9   :  { %p110_p3 = scmp.ne.s32.totalorder %s16_s10, %s109_s18  ;;  %p115_p5 = scmp.lt.s32.totalorder %s109_s18, %s109_s18 }
   0xb   :  { %p116_p6 = por %p115_p5, %p114_p4 }
   0xd   :  { %p117_p7 = pnand %p116_p6, %p110_p3 }
   0xf   :  { %120 = shalt.err (!%p117_p7)
}
  0x10   :  { %18 = dma.hbm_to_vmem [thread:$0]  %s194_s0, 256, %s16_s10, [#allocation3]  }
  0x11   :  { %143 = dma.done.wait [#allocation3], 256  }
  0x12   :  { %144 = vsyncadd [#allocation3], 4294967040  ;;  %v148_v0 = vmov 0   ;;  %v24_v1 = vld [vmem:[#allocation2] sm:$0xff]  ;;  %v25_v2 = vld [vmem:[#allocation2 + $0x8] sm:$0xff]  ;;  %v149_v18 = vmov 1  }
  0x13   :  { %93 = vset.pattern.permute.xlu0 %v148_v0  ;;  %94 = vset.pattern.permute.xlu1 %v148_v0  ;;  %v47_v19 = vld [vmem:[%s195_s1] sm:$0xff]  ;;  %s150_s22 = smov 1   ;;  %s151_s23 = smov [#allocation5]  }
  0x14   :  { %28 = vperm.xlu0 %93, %v24_v1   ;;  %s79_s24 = sshll.u32 %s151_s23, 4  ;;  %s80_s24 = int_to_ptr.vmem [resolvable:$true] %s79_s24 }
  0x15   :  { %s121_s1 = scalar_lea.vmem %s80_s24, 256  ;;  %p126_p9 = scmp.lt.s32.totalorder %s80_s24, %s80_s24 }
  0x16   :  { %p122_p8 = scmp.ne.s32.totalorder %s80_s24, %s121_s1  ;;  %p127_p10 = scmp.lt.s32.totalorder %s121_s1, %s121_s1 }
  0x18   :  { %96 = vset.pattern.permute.xlu0 %v149_v18  ;;  %p128_p11 = por %p127_p10, %p126_p9 }
  0x1a   :  { %p129_p12 = pnand %p128_p11, %p122_p8 }
  0x93   :  { %v29_v3 = vpop.permute.xlu0 %28 }
  0x94   :  { %v31_v4 = vsub.f32 %v24_v1, %v29_v3  ;;  %v32_v5 = vsub.f32 %v25_v2, %v29_v3 }
  0x96   :  { %v33_v6 = vadd.f32 %v32_v5, %v31_v4  ;;  %v37_v7 = vmul.f32 %v31_v4, %v31_v4  ;;  %v38_v8 = vmul.f32 %v32_v5, %v32_v5 }
  0x98   :  { %34 = vadd.xlane.f32.xlu0 %v33_v6  ;;  %v39_v9 = vadd.f32 %v38_v8, %v37_v7 }
  0x9a   :  { %40 = vadd.xlane.f32.xlu1 %v39_v9 }
 0x125   :  { %v35_v10 = vpop.xlane.xlu0 %34 }
 0x126   :  { %v36_v11 = vmul.f32 0.00390625, %v35_v10 }
 0x127   :  { %v41_v12 = vpop.xlane.xlu1 %40 }
 0x128   :  { %v43_v13 = vmul.f32 %v36_v11, %v36_v11  ;;  %v42_v14 = vmul.f32 0.00390625, %v41_v12  ;;  %v46_v21 = vadd.f32 %v36_v11, %v24_v1 }
 0x12a   :  { %v44_v15 = vsub.f32 %v42_v14, %v43_v13 }
 0x12c   :  { %v45_v16 = vmax.f32 %v44_v15, 0.0 }
 0x12e   :  { %v48_v17 = vadd.f32 1e-05, %v45_v16 }
 0x130   :  { %97 = vrsqrt.f32 %v48_v17 }
 0x13a   :  { %v98_v20 = vpop.eup %97 }
 0x13b   :  { %v50_v22 = vmul.f32 %v98_v20, %v47_v19 }
 0x13d   :  { %v51_v23 = vmul.f32 %v50_v22, %v46_v21 }
 0x13f   :  { %53 = vrot.lane.b32.xlu1 %v51_v23, %s150_s22 }
 0x143   :  { %59 = vperm.xlu1 %94, %v50_v22  }
 0x147   :  { %95 = vset.pattern.permute.xlu1 %v149_v18 }
 0x1b1   :  { %v54_v24 = vpop.permute.xlu1 %53 }
 0x1b2   :  { %v56_v25 = vsub.f32 %v47_v19, %v54_v24 }
 0x1b4   :  { %66 = vperm.xlu1 %95, %v56_v25  }
 0x1c2   :  { %v60_v26 = vpop.permute.xlu1 %59 }
 0x1c3   :  { %v62_v27 = vmul.f32 %v60_v26, %v24_v1  ;;  %v63_v28 = vmul.f32 %v60_v26, %v25_v2 }
 0x233   :  { %v67_v29 = vpop.permute.xlu1 %66 }
 0x234   :  { %v69_v30 = vadd.f32 %v67_v29, %v62_v27  ;;  %v70_v31 = vadd.f32 %v67_v29, %v63_v28 }
 0x236   :  { %71 = vst [vmem:[#allocation5] sm:$0xff] %v69_v30  ;;  %72 = vst [vmem:[#allocation5 + $0x8] sm:$0xff] %v70_v31 }
 0x237   :  { %132 = shalt.err (!%p129_p12)
}
 0x238   :  { %s133_s27 = scalar_lea.hbm %s196_s2, 256 }
 0x239   :  { %p134_p13 = scmp.ne.s32.totalorder %s196_s2, %s133_s27  ;;  %p137_p0 = scmp.lt.u32.totalorder %s133_s27, %s196_s2 }
 0x23b   :  { %p139_p1 = pnand %p137_p0, %p134_p13 }
 0x23d   :  { %142 = shalt.err (!%p139_p1)
}
 0x23e   :  { %82 = dma.vmem_to_hbm [thread:$0]  %s80_s24, 256, %s196_s2, [#allocation4]  }
 0x23f   :  { %145 = dma.done.wait [#allocation4], 256  }
 0x240   :  { %146 = vsyncadd [#allocation4], 4294967040 }
 0x241   :  { %86 = vsyncpa [#allocation3], 1 }
 0x242   :  { %87 = vsyncpa [#allocation4], 1 }

</bundles_post_ra>
